<compile_context>
chip_gen: v7x
topology: tpu7x:2x2x1
jax: 0.10.0
libtpu: 0.0.40
codegen_flags: <defaults>
</compile_context>

<pallas_src>
import functools

import jax
import jax.numpy as jnp
from jax.experimental import pallas as pl
from jax.experimental.pallas import tpu as pltpu

LAMBD = 0.0051


def _round_up(x, m):
    return ((x + m - 1) // m) * m


def _largest_tile(dim, cap):
    """Largest multiple of 128 that divides `dim` (dim % 128 == 0) and is <= cap."""
    t = max(128, min(int(cap), dim))
    t -= t % 128
    while dim % t:
        t -= 128
    return t


def _vmem_capacity_bytes():
    """Physical VMEM per core; generation-aware with a safe (v7x-sized) fallback."""
    try:
        cap = getattr(pltpu.get_tpu_info(), "vmem_capacity_bytes", None)
        if cap:
            return int(cap)
    except Exception:
        pass
    return 64 * 1024 * 1024


def _barlow_kernel(z1_ref, z2_ref, out_ref, acc_ref, *, tk, inv_b, lambd):
    # All program_id / num_programs reads happen at the TOP LEVEL of the kernel
    # body (never inside pl.when closures) -- required for clean lowering in
    # both compiled and interpret modes.
    i = pl.program_id(0)
    j = pl.program_id(1)
    k = pl.program_id(2)
    nk = pl.num_programs(2)

    # z1 is a resident (B_pad, tm) panel (block index depends only on i), so it
    # is DMA'd from HBM exactly once overall.  Slice the current batch slab.
    z1_slab = z1_ref[pl.ds(k * tk, tk), :]

    # Contract over the batch axis (dim 0 of both operands).  Mosaic drives the
    # MXU with a transposed-LHS matmul (no in-kernel XLU transpose); inputs
    # stay in their native dtype, accumulation is f32.
    prod = jax.lax.dot_general(
        z1_slab, z2_ref[...],
        dimension_numbers=(((0,), (0,)), ((), ())),
        preferred_element_type=jnp.float32,
    )

    # First k step writes directly (skips zero-fill + read-modify-write pass).
    @pl.when(k == 0)
    def _init():
        acc_ref[...] = prod

    @pl.when(k > 0)
    def _accumulate():
        acc_ref[...] += prod

    @pl.when(k == nk - 1)
    def _finalize():
        acc = acc_ref[...]
        tm = acc.shape[0]
        inv_b2 = inv_b * inv_b

        # Every tile contributes lambd * sum(c^2); fold the 1/B scaling into
        # the scalar algebra instead of materializing c = acc / B.
        val = (lambd * inv_b2) * jnp.sum(acc * acc)

        # The scalar partial lands at [0, 0] of a lane-dense (8, 128) output
        # block; every other lane is an exact zero so the wrapper can simply
        # jnp.sum the whole partials array.
        r8 = jax.lax.broadcasted_iota(jnp.int32, (8, 128), 0)
        c128 = jax.lax.broadcasted_iota(jnp.int32, (8, 128), 1)
        at00 = (r8 == 0) & (c128 == 0)

        @pl.when(i != j)
        def _off_diag_tile():
            out_ref[...] = jnp.where(at00, val, 0.0)

        @pl.when(i == j)
        def _diag_tile():
            # Diagonal correction (only i == j tiles pay for the masking):
            #   sum_diag[(c-1)^2 - lambd*c^2]
            #     = (1-lambd)/B^2 * sum(d^2) - 2/B * sum(d) + tm   with d = diag(acc)
            row = jax.lax.broadcasted_iota(jnp.int32, acc.shape, 0)
            col = jax.lax.broadcasted_iota(jnp.int32, acc.shape, 1)
            d = jnp.where(row == col, acc, 0.0)
            corr = ((1.0 - lambd) * inv_b2 * jnp.sum(d * d)
                    - 2.0 * inv_b * jnp.sum(d)
                    + float(tm))
            out_ref[...] = jnp.where(at00, val + corr, 0.0)


def barlow_loss(z1, z2, lambd=LAMBD, max_tile=None):
    assert z1.shape == z2.shape and z1.ndim == 2
    B, D = z1.shape

    # Pad to multiples of 128.  Zero padding leaves c unchanged except for
    # padded diagonal entries, each contributing exactly +1.0 to the padded
    # loss (subtracted analytically at the end).
    B_pad = _round_up(B, 128)
    D_pad = _round_up(D, 128)
    if (B_pad, D_pad) != (B, D):
        z1 = jnp.pad(z1, ((0, B_pad - B), (0, D_pad - D)))
        z2 = jnp.pad(z2, ((0, B_pad - B), (0, D_pad - D)))

    itemsize = jnp.dtype(z1.dtype).itemsize
    vmem_cap = _vmem_capacity_bytes()      # 64 MiB (v7x) / 128 MiB (v5e, v6e)
    budget = int(vmem_cap * 0.70)          # leave headroom for Mosaic internals

    # Output tile (tm == tn required so diagonal elements live only on i == j
    # tiles).  Bigger is better: output traffic is one scalar per tile and the
    # only quadratic buffer is the f32 accumulator.
    tm_cap = 2048 if vmem_cap >= 96 * 1024 * 1024 else 1024
    if max_tile is not None:
        tm_cap = min(tm_cap, max_tile)
    tm = _largest_tile(D_pad, tm_cap)
    # Shrink until the double-buffered resident z1 panel + accumulator fit in
    # half the budget.
    while tm > 128 and (2 * B_pad * tm * itemsize + tm * tm * 4) > budget // 2:
        tm = _largest_tile(D_pad, tm - 128)
    # Keep at least a 2x2 output-tile grid when D allows it, so the two
    # "parallel" axes can shard across both TensorCores on v7x.
    if D_pad // tm < 2 and D_pad >= 256:
        tm = _largest_tile(D_pad, max(128, tm // 2))
    tn = tm

    # Batch (contraction) tile: as large as fits in ~1/4 of the budget for the
    # double-buffered z2 slab (amortizes per-grid-step overhead, long MXU K).
    tk_cap = min(4096, max(128, (budget // 4) // max(1, 2 * tn * itemsize)))
    if max_tile is not None:
        tk_cap = min(tk_cap, max_tile)
    tk = _largest_tile(B_pad, tk_cap)

    gi, gj, gk = D_pad // tm, D_pad // tn, B_pad // tk

    # VMEM: double-buffered z1 panel + double-buffered z2 slab + f32 accumulator
    # + double-buffered (8, 128) output block.
    vmem_needed = (2 * B_pad * tm * itemsize
                   + 2 * tk * tn * itemsize
                   + tm * tn * 4
                   + 2 * 8 * 128 * 4)
    vmem_limit = int(min(int(vmem_cap * 0.9),
                         max(vmem_needed + (4 << 20), 32 << 20)))

    kernel = functools.partial(_barlow_kernel, tk=tk,
                               inv_b=1.0 / B, lambd=float(lambd))

    partials = pl.pallas_call(
        kernel,
        out_shape=jax.ShapeDtypeStruct((gi * 8, gj * 128), jnp.float32),
        grid_spec=pltpu.PrefetchScalarGridSpec(
            num_scalar_prefetch=0,
            grid=(gi, gj, gk),
            in_specs=[
                # z1: full-batch panel, resident across j and k -> read once.
                pl.BlockSpec((B_pad, tm), lambda i, j, k: (0, i)),
                # z2: streamed (tk, tn) slab per k step -> read gi times.
                pl.BlockSpec((tk, tn), lambda i, j, k: (k, j)),
            ],
            out_specs=pl.BlockSpec((8, 128), lambda i, j, k: (i, j)),
            scratch_shapes=[pltpu.VMEM((tm, tn), jnp.float32)],
        ),
        compiler_params=pltpu.CompilerParams(
            dimension_semantics=("parallel", "parallel", "arbitrary"),
            vmem_limit_bytes=vmem_limit,
        ),
        cost_estimate=pl.CostEstimate(
            flops=2 * B_pad * D_pad * D_pad,
            transcendentals=0,
            bytes_accessed=(B_pad * D_pad * itemsize          # z1 read once
                            + gi * B_pad * D_pad * itemsize   # z2 read gi times
                            + gi * gj * 8 * 128 * 4),
        ),
    )(z1, z2)

    # Remove the padded-diagonal contribution (+1 per padded diagonal element).
    return jnp.sum(partials) - float(D_pad - D)


def _reference(z1, z2, lambd=LAMBD):
    B = z1.shape[0]
    c = jnp.dot(z1.T.astype(jnp.float32), z2.astype(jnp.float32),
                precision=jax.lax.Precision.HIGHEST) / B
    d = jnp.diagonal(c)
    on_diag = jnp.sum((d - 1.0) ** 2)
    off_diag = jnp.sum(c * c) - jnp.sum(d * d)
    return on_diag + lambd * off_diag


if __name__ == "__main__":
    key = jax.random.PRNGKey(0)
    k1, k2, k3, k4, k5, k6 = jax.random.split(key, 6)

    # Case 1: tiny shape -> single tile after padding, grid (1, 1, 1).
    z1 = jax.random.normal(k1, (8, 32), dtype=jnp.float32)
    z2 = jax.random.normal(k2, (8, 32), dtype=jnp.float32)
    loss = jax.block_until_ready(barlow_loss(z1, z2))
    ref = jax.block_until_ready(_reference(z1, z2))
    assert jnp.allclose(loss, ref, rtol=2e-3, atol=2e-2), (loss, ref)

    # Case 2: multi-tile feature dim (exercises diagonal + off-diagonal tiles).
    z1b = jax.random.normal(k3, (16, 160), dtype=jnp.float32)
    z2b = jax.random.normal(k4, (16, 160), dtype=jnp.float32)
    loss2 = jax.block_until_ready(barlow_loss(z1b, z2b))
    ref2 = jax.block_until_ready(_reference(z1b, z2b))
    assert jnp.allclose(loss2, ref2, rtol=2e-3, atol=2e-2), (loss2, ref2)

    # Case 3: padding on both axes + multi-step batch reduction (gk > 1),
    # forced small tiles to exercise the full (2, 2, 2) grid at small shapes.
    z1c = jax.random.normal(k5, (200, 160), dtype=jnp.float32)
    z2c = jax.random.normal(k6, (200, 160), dtype=jnp.float32)
    loss3 = jax.block_until_ready(barlow_loss(z1c, z2c, max_tile=128))
    ref3 = jax.block_until_ready(_reference(z1c, z2c))
    assert jnp.allclose(loss3, ref3, rtol=2e-3, atol=2e-2), (loss3, ref3)

    print("KERNEL_OK")
</pallas_src>

<mosaic_0001>
module attributes {stable_mosaic.version = 11 : i64} {
  func.func @_barlow_kernel(%arg0: i32, %arg1: i32, %arg2: i32, %arg3: memref<128x128xf32, #tpu.memory_space<vmem>>, %arg4: memref<128x128xf32, #tpu.memory_space<vmem>>, %arg5: memref<8x128xf32, #tpu.memory_space<vmem>>, %arg6: memref<128x128xf32, #tpu.memory_space<vmem>>) attributes {dimension_semantics = [#tpu.dimension_semantics<parallel>, #tpu.dimension_semantics<parallel>, #tpu.dimension_semantics<arbitrary>], iteration_bounds = array<i64: 1, 1, 1>, scalar_prefetch = 0 : i64, scratch_operands = 1 : i64, tpu.core_type = #tpu.core_type<tc>, window_params = [{transform_indices = @transform_0, window_bounds = array<i64: 128, 128>}, {transform_indices = @transform_1, window_bounds = array<i64: 128, 128>}, {transform_indices = @transform_2, window_bounds = array<i64: 8, 128>}]} {
    %c128_i32 = arith.constant 128 : i32
    %0 = arith.muli %arg2, %c128_i32 : i32
    %1 = arith.index_cast %0 : i32 to index
    %c0 = arith.constant 0 : index
    %2 = vector.load %arg3[%1, %c0] : memref<128x128xf32, #tpu.memory_space<vmem>>, vector<128x128xf32>
    %c0_0 = arith.constant 0 : index
    %c0_1 = arith.constant 0 : index
    %3 = vector.load %arg4[%c0_0, %c0_1] : memref<128x128xf32, #tpu.memory_space<vmem>>, vector<128x128xf32>
    %cst = arith.constant dense<0.000000e+00> : vector<128x128xf32>
    %4 = tpu.matmul %2, %3, %cst {dimension_numbers = #tpu.dot_dimension_numbers<[0], [0], [1], [1], [0, 1, 1, 1], [], []>} : vector<128x128xf32>, vector<128x128xf32>, vector<128x128xf32> -> vector<128x128xf32>
    %c0_i32 = arith.constant 0 : i32
    %5 = arith.cmpi eq, %arg2, %c0_i32 : i32
    %6 = arith.extui %5 : i1 to i32
    %c0_i32_2 = arith.constant 0 : i32
    %7 = arith.cmpi ne, %6, %c0_i32_2 : i32
    scf.if %7 {
      %c0_7 = arith.constant 0 : index
      %c0_8 = arith.constant 0 : index
      %14 = vector.load %arg6[%c0_7, %c0_8] : memref<128x128xf32, #tpu.memory_space<vmem>>, vector<128x128xf32>
      tpu.vector_store %arg6[%c0_7, %c0_8], %4 {strides = array<i32>} : memref<128x128xf32, #tpu.memory_space<vmem>>, vector<128x128xf32>,
    } else {
    }
    %c0_i32_3 = arith.constant 0 : i32
    %8 = arith.cmpi sgt, %arg2, %c0_i32_3 : i32
    %9 = arith.extui %8 : i1 to i32
    %c0_i32_4 = arith.constant 0 : i32
    %10 = arith.cmpi ne, %9, %c0_i32_4 : i32
    scf.if %10 {
      %c0_7 = arith.constant 0 : index
      %c0_8 = arith.constant 0 : index
      %14 = vector.load %arg6[%c0_7, %c0_8] : memref<128x128xf32, #tpu.memory_space<vmem>>, vector<128x128xf32>
      %15 = arith.addf %14, %4 : vector<128x128xf32>
      %c0_9 = arith.constant 0 : index
      %c0_10 = arith.constant 0 : index
      %16 = vector.load %arg6[%c0_9, %c0_10] : memref<128x128xf32, #tpu.memory_space<vmem>>, vector<128x128xf32>
      tpu.vector_store %arg6[%c0_9, %c0_10], %15 {strides = array<i32>} : memref<128x128xf32, #tpu.memory_space<vmem>>, vector<128x128xf32>,
    } else {
    }
    %c0_i32_5 = arith.constant 0 : i32
    %11 = arith.cmpi eq, %arg2, %c0_i32_5 : i32
    %12 = arith.extui %11 : i1 to i32
    %c0_i32_6 = arith.constant 0 : i32
    %13 = arith.cmpi ne, %12, %c0_i32_6 : i32
    scf.if %13 {
      %c0_7 = arith.constant 0 : index
      %c0_8 = arith.constant 0 : index
      %14 = vector.load %arg6[%c0_7, %c0_8] : memref<128x128xf32, #tpu.memory_space<vmem>>, vector<128x128xf32>
      %15 = arith.mulf %14, %14 : vector<128x128xf32>
      %16 = vector.shape_cast %15 : vector<128x128xf32> to vector<1x128x128xf32>
      %cst_9 = arith.constant dense<0.000000e+00> : vector<1xf32>
      %17 = vector.multi_reduction <add>, %16, %cst_9 [1, 2] : vector<1x128x128xf32> to vector<1xf32>
      %18 = vector.shape_cast %17 : vector<1xf32> to vector<1x1x1xf32>
      %19 = vector.extract %18[0, 0, 0] : f32 from vector<1x1x1xf32>
      %cst_10 = arith.constant 7.968750e-05 : f32
      %20 = arith.mulf %cst_10, %19 : f32
      %21 = tpu.iota {dimensions = array<i32: 0>} : vector<8x128xi32>
      %22 = tpu.iota {dimensions = array<i32: 1>} : vector<8x128xi32>
      %c0_i32_11 = arith.constant 0 : i32
      %23 = vector.broadcast %c0_i32_11 : i32 to vector<8x128xi32>
      %24 = arith.cmpi eq, %21, %23 : vector<8x128xi32>
      %c0_i32_12 = arith.constant 0 : i32
      %25 = vector.broadcast %c0_i32_12 : i32 to vector<8x128xi32>
      %26 = arith.cmpi eq, %22, %25 : vector<8x128xi32>
      %27 = arith.andi %24, %26 : vector<8x128xi1>
      %28 = arith.cmpi ne, %arg0, %arg1 : i32
      %29 = arith.extui %28 : i1 to i32
      %c0_i32_13 = arith.constant 0 : i32
      %30 = arith.cmpi ne, %29, %c0_i32_13 : i32
      scf.if %30 {
        %cst_15 = arith.constant 0.000000e+00 : f32
        %34 = vector.broadcast %20 : f32 to vector<8x128xf32>
        %35 = vector.broadcast %cst_15 : f32 to vector<8x128xf32>
        %36 = arith.select %27, %34, %35 : vector<8x128xi1>, vector<8x128xf32>
        %c0_16 = arith.constant 0 : index
        %c0_17 = arith.constant 0 : index
        %37 = vector.load %arg5[%c0_16, %c0_17] : memref<8x128xf32, #tpu.memory_space<vmem>>, vector<8x128xf32>
        tpu.vector_store %arg5[%c0_16, %c0_17], %36 {strides = array<i32>} : memref<8x128xf32, #tpu.memory_space<vmem>>, vector<8x128xf32>,
      } else {
      }
      %31 = arith.cmpi eq, %arg0, %arg1 : i32
      %32 = arith.extui %31 : i1 to i32
      %c0_i32_14 = arith.constant 0 : i32
      %33 = arith.cmpi ne, %32, %c0_i32_14 : i32
      scf.if %33 {
        %34 = tpu.iota {dimensions = array<i32: 0>} : vector<128x128xi32>
        %35 = tpu.iota {dimensions = array<i32: 1>} : vector<128x128xi32>
        %36 = arith.cmpi eq, %34, %35 : vector<128x128xi32>
        %cst_15 = arith.constant 0.000000e+00 : f32
        %37 = vector.broadcast %cst_15 : f32 to vector<128x128xf32>
        %38 = arith.select %36, %14, %37 : vector<128x128xi1>, vector<128x128xf32>
        %39 = arith.mulf %38, %38 : vector<128x128xf32>
        %40 = vector.shape_cast %39 : vector<128x128xf32> to vector<1x128x128xf32>
        %cst_16 = arith.constant dense<0.000000e+00> : vector<1xf32>
        %41 = vector.multi_reduction <add>, %40, %cst_16 [1, 2] : vector<1x128x128xf32> to vector<1xf32>
        %42 = vector.shape_cast %41 : vector<1xf32> to vector<1x1x1xf32>
        %43 = vector.extract %42[0, 0, 0] : f32 from vector<1x1x1xf32>
        %cst_17 = arith.constant 0.0155453123 : f32
        %44 = arith.mulf %cst_17, %43 : f32
        %45 = vector.shape_cast %38 : vector<128x128xf32> to vector<1x128x128xf32>
        %cst_18 = arith.constant dense<0.000000e+00> : vector<1xf32>
        %46 = vector.multi_reduction <add>, %45, %cst_18 [1, 2] : vector<1x128x128xf32> to vector<1xf32>
        %47 = vector.shape_cast %46 : vector<1xf32> to vector<1x1x1xf32>
        %48 = vector.extract %47[0, 0, 0] : f32 from vector<1x1x1xf32>
        %cst_19 = arith.constant 2.500000e-01 : f32
        %49 = arith.mulf %cst_19, %48 : f32
        %50 = arith.subf %44, %49 : f32
        %cst_20 = arith.constant 1.280000e+02 : f32
        %51 = arith.addf %50, %cst_20 : f32
        %52 = arith.addf %20, %51 : f32
        %cst_21 = arith.constant 0.000000e+00 : f32
        %53 = vector.broadcast %52 : f32 to vector<8x128xf32>
        %54 = vector.broadcast %cst_21 : f32 to vector<8x128xf32>
        %55 = arith.select %27, %53, %54 : vector<8x128xi1>, vector<8x128xf32>
        %c0_22 = arith.constant 0 : index
        %c0_23 = arith.constant 0 : index
        %56 = vector.load %arg5[%c0_22, %c0_23] : memref<8x128xf32, #tpu.memory_space<vmem>>, vector<8x128xf32>
        tpu.vector_store %arg5[%c0_22, %c0_23], %55 {strides = array<i32>} : memref<8x128xf32, #tpu.memory_space<vmem>>, vector<8x128xf32>,
      } else {
      }
    } else {
    }
    return
  }
  func.func @transform_0(%arg0: i32, %arg1: i32, %arg2: i32) -> (i32, i32) {
    %c0_i32 = arith.constant 0 : i32
    %c0_i32_0 = arith.constant 0 : i32
    return %c0_i32, %arg0 : i32, i32
  }
  func.func @transform_1(%arg0: i32, %arg1: i32, %arg2: i32) -> (i32, i32) {
    %c0_i32 = arith.constant 0 : i32
    return %arg2, %arg1 : i32, i32
  }
  func.func @transform_2(%arg0: i32, %arg1: i32, %arg2: i32) -> (i32, i32) {
    %c0_i32 = arith.constant 0 : i32
    return %arg0, %arg1 : i32, i32
  }
}

</mosaic_0001>

<bundles_post_ra>
// kernel: tpu_custom_call.1
= control target key start
LH: loop header
LB: loop body
LE: loop exit
PB: predicated region body
PF: predicated region fallthrough
CT: control target
= control target key end

     0   :  { %7 = vsyncpa [#allocation4], 0  ;;  %s849_s0 = inlined_call_operand.hbm [shape: f32[128,128], index: 0, kind: input, shape index: {}]   ;;  %s850_s1 = inlined_call_operand.hbm [shape: f32[128,128], index: 1, kind: input, shape index: {}]   ;;  %s851_s2 = inlined_call_operand.hbm [shape: f32[8,128], index: 2, kind: output, shape index: {}]  }
   0x1   :  { %8 = vsyncpa [#allocation7], 0 }
   0x2   :  { %9 = vsyncpa [#allocation5], 0  ;;  %s755_s9 = smov [#allocation3]   ;;  %s683_s13 = scalar_lea.hbm %s849_s0, 2048 }
   0x3   :  { %s15_s10 = sshll.u32 %s755_s9, 4  ;;  %p684_p0 = scmp.ne.s32.totalorder %s849_s0, %s683_s13  ;;  %s16_s10 = int_to_ptr.vmem [resolvable:$true] %s15_s10 }
   0x4   :  { %p687_p1 = scmp.lt.u32.totalorder %s683_s13, %s849_s0 }
   0x6   :  { %p689_p2 = pnand %p687_p1, %p684_p0 }
   0x8   :  { %692 = shalt.err (!%p689_p2)
}
   0x9   :  { %s693_s18 = scalar_lea.vmem %s16_s10, 2048  ;;  %p698_p4 = scmp.lt.s32.totalorder %s16_s10, %s16_s10 }
   0xa   :  { %p694_p3 = scmp.ne.s32.totalorder %s16_s10, %s693_s18  ;;  %p699_p5 = scmp.lt.s32.totalorder %s693_s18, %s693_s18 }
   0xc   :  { %p700_p6 = por %p699_p5, %p698_p4 }
   0xe   :  { %p701_p7 = pnand %p700_p6, %p694_p3 }
  0x10   :  { %704 = shalt.err (!%p701_p7)
}
  0x11   :  { %s756_s19 = smov 128   ;;  %s757_s20 = smov 8  }
  0x12   :  { %21 = dma.hbm_to_vmem [thread:$0]  %s849_s0, 2048, %s16_s10, [#allocation4], %s756_s19, %s756_s19, %s757_s20  }
  0x13   :  { %s758_s23 = smov [#allocation6]   ;;  %s705_s27 = scalar_lea.hbm %s850_s1, 2048 }
  0x14   :  { %s27_s24 = sshll.u32 %s758_s23, 4  ;;  %p706_p8 = scmp.ne.s32.totalorder %s850_s1, %s705_s27  ;;  %s28_s24 = int_to_ptr.vmem [resolvable:$true] %s27_s24 }
  0x15   :  { %p709_p9 = scmp.lt.u32.totalorder %s705_s27, %s850_s1 }
  0x17   :  { %p711_p10 = pnand %p709_p9, %p706_p8 }
  0x19   :  { %714 = shalt.err (!%p711_p10)
}
  0x1a   :  { %s715_s4 = scalar_lea.vmem %s28_s24, 2048  ;;  %p720_p12 = scmp.lt.s32.totalorder %s28_s24, %s28_s24 }
  0x1b   :  { %p716_p11 = scmp.ne.s32.totalorder %s28_s24, %s715_s4  ;;  %p721_p13 = scmp.lt.s32.totalorder %s715_s4, %s715_s4 }
  0x1d   :  { %p722_p0 = por %p721_p13, %p720_p12 }
  0x1f   :  { %p723_p1 = pnand %p722_p0, %p716_p11 }
  0x21   :  { %726 = shalt.err (!%p723_p1)
}
  0x22   :  { %33 = dma.hbm_to_vmem [thread:$0]  %s850_s1, 2048, %s28_s24, [#allocation7], %s756_s19, %s756_s19, %s757_s20  }
  0x23   :  { %749 = dma.done.wait [#allocation4], 2048  }
  0x24   :  { %750 = vsyncadd [#allocation4], 4294965248 }
  0x25   :  { %751 = dma.done.wait [#allocation7], 2048  }
  0x26   :  { %752 = vsyncadd [#allocation7], 4294965248  ;;  %v42_v0 = vld [vmem:[#allocation3] sm:$0xff]  ;;  %v43_v1 = vld [vmem:[#allocation3 + $0x8] sm:$0xff]  ;;  %v383_v56 = vlaneseq  ;;  %s759_s13 = smov [#allocation8]  }
  0x27   :  { %74 = vxpose.xlu0.b32.start [1/16] %v42_v0, 128  ;;  %v58_v2 = vld [vmem:[#allocation6] sm:$0xff]  ;;  %v59_v3 = vld [vmem:[#allocation6 + $0x8] sm:$0xff]  ;;  %v44_v4 = vld [vmem:[#allocation3 + $0x10] sm:$0xff]  ;;  %s526_s14 = sshll.u32 %s759_s13, 4  ;;  %s527_s14 = int_to_ptr.vmem [resolvable:$true] %s526_s14 }
  0x28   :  { %v624_v5 = vpack.c.bf16 %v59_v3, %v58_v2  ;;  %v60_v6 = vld [vmem:[#allocation6 + $0x10] sm:$0xff]  ;;  %v61_v7 = vld [vmem:[#allocation6 + $0x18] sm:$0xff]  ;;  %v62_v9 = vld [vmem:[#allocation6 + $0x20] sm:$0xff]  ;;  %v799_v57 = vshrl.u32 %v383_v56, 7  ;;  %v801_v58 = vand.u32 127, %v383_v56  ;;  %s727_s16 = scalar_lea.vmem %s527_s14, 128  ;;  %p732_p3 = scmp.lt.s32.totalorder %s527_s14, %s527_s14 }
  0x29   :  { %v628_v8 = vpack.c.bf16 %v61_v7, %v60_v6  ;;  %v63_v10 = vld [vmem:[#allocation6 + $0x28] sm:$0xff]  ;;  %v45_v11 = vld [vmem:[#allocation3 + $0x18] sm:$0xff]  ;;  %v64_v13 = vld [vmem:[#allocation6 + $0x30] sm:$0xff]  ;;  %p728_p2 = scmp.ne.s32.totalorder %s527_s14, %s727_s16  ;;  %p733_p4 = scmp.lt.s32.totalorder %s727_s16, %s727_s16 }
  0x2a   :  { %625 = vmatprep.subr.bf16.mxu0 %v624_v5  ;;  %656 = vmatprep.subr.bf16.mxu1 %v624_v5  ;;  %v632_v12 = vpack.c.bf16 %v63_v10, %v62_v9  ;;  %v65_v14 = vld [vmem:[#allocation6 + $0x38] sm:$0xff]  ;;  %v46_v15 = vld [vmem:[#allocation3 + $0x20] sm:$0xff]  ;;  %v67_v18 = vld [vmem:[#allocation6 + $0x48] sm:$0xff]  ;;  %v401_v59 = vadd.s32 8, %v799_v57  ;;  %vm416_vm1 = vcmp.eq.s32.totalorder %v799_v57, %v801_v58  ;;  %v402_v6 = vadd.s32 16, %v799_v57 }
  0x2b   :  { %75 = vxpose.xlu0.b32.cont [2/16] %v43_v1, 128  ;;  %627 = vmatpush3.bf16.msra.mxu0 %v624_v5  ;;  %v636_v16 = vpack.c.bf16 %v65_v14, %v64_v13  ;;  %v66_v17 = vld [vmem:[#allocation6 + $0x40] sm:$0xff]  ;;  %v47_v19 = vld [vmem:[#allocation3 + $0x28] sm:$0xff]  ;;  %v68_v21 = vld [vmem:[#allocation6 + $0x50] sm:$0xff]  ;;  %p734_p5 = por %p733_p4, %p732_p3 }
  0x2c   :  { %629 = vmatprep.subr.bf16.mxu0 %v628_v8  ;;  %664 = vmatpush3.bf16.msra.mxu1 %v624_v5  ;;  %v640_v20 = vpack.c.bf16 %v67_v18, %v66_v17  ;;  %v69_v22 = vld [vmem:[#allocation6 + $0x58] sm:$0xff]  ;;  %v48_v23 = vld [vmem:[#allocation3 + $0x30] sm:$0xff]  ;;  %v70_v25 = vld [vmem:[#allocation6 + $0x60] sm:$0xff]  ;;  %vm417_vm0 = vcmp.eq.s32.totalorder %v401_v59, %v801_v58  ;;  %v403_v5 = vadd.s32 24, %v799_v57  ;;  %vm418_vm3 = vcmp.eq.s32.totalorder %v402_v6, %v801_v58 }
  0x2d   :  { %657 = vmatprep.subr.bf16.mxu1 %v628_v8  ;;  %v644_v24 = vpack.c.bf16 %v69_v22, %v68_v21  ;;  %v71_v26 = vld [vmem:[#allocation6 + $0x68] sm:$0xff]  ;;  %v49_v27 = vld [vmem:[#allocation3 + $0x38] sm:$0xff]  ;;  %v72_v29 = vld [vmem:[#allocation6 + $0x70] sm:$0xff]  ;;  %v404_v17 = vadd.s32 32, %v799_v57  ;;  %p735_p6 = pnand %p734_p5, %p728_p2 }
  0x2e   :  { %v648_v28 = vpack.c.bf16 %v71_v26, %v70_v25  ;;  %v73_v30 = vld [vmem:[#allocation6 + $0x78] sm:$0xff]  ;;  %v50_v31 = vld [vmem:[#allocation3 + $0x40] sm:$0xff]  ;;  %v51_v33 = vld [vmem:[#allocation3 + $0x48] sm:$0xff]  ;;  %vm419_vm2 = vcmp.eq.s32.totalorder %v403_v5, %v801_v58 }
  0x2f   :  { %76 = vxpose.xlu0.b32.cont [3/16] %v44_v4, 128  ;;  %631 = vmatpush3.bf16.msra.mxu0 %v628_v8  ;;  %v652_v32 = vpack.c.bf16 %v73_v30, %v72_v29  ;;  %v52_v34 = vld [vmem:[#allocation3 + $0x50] sm:$0xff]  ;;  %v53_v35 = vld [vmem:[#allocation3 + $0x58] sm:$0xff]  ;;  %v54_v36 = vld [vmem:[#allocation3 + $0x60] sm:$0xff]  ;;  %vm420_vm5 = vcmp.eq.s32.totalorder %v404_v17, %v801_v58 }
  0x30   :  { %633 = vmatprep.subr.bf16.mxu0 %v632_v12  ;;  %665 = vmatpush3.bf16.msra.mxu1 %v628_v8  ;;  %v55_v37 = vld [vmem:[#allocation3 + $0x68] sm:$0xff]  ;;  %v56_v38 = vld [vmem:[#allocation3 + $0x70] sm:$0xff]  ;;  %v57_v39 = vld [vmem:[#allocation3 + $0x78] sm:$0xff] }
  0x31   :  { %658 = vmatprep.subr.bf16.mxu1 %v632_v12 }
  0x33   :  { %77 = vxpose.xlu0.b32.cont [4/16] %v45_v11, 128  ;;  %635 = vmatpush3.bf16.msra.mxu0 %v632_v12 }
  0x34   :  { %637 = vmatprep.subr.bf16.mxu0 %v636_v16  ;;  %666 = vmatpush3.bf16.msra.mxu1 %v632_v12 }
  0x35   :  { %659 = vmatprep.subr.bf16.mxu1 %v636_v16 }
  0x37   :  { %78 = vxpose.xlu0.b32.cont [5/16] %v46_v15, 128  ;;  %639 = vmatpush3.bf16.msra.mxu0 %v636_v16 }
  0x38   :  { %641 = vmatprep.subr.bf16.mxu0 %v640_v20  ;;  %667 = vmatpush3.bf16.msra.mxu1 %v636_v16  ;;  %v405_v16 = vadd.s32 40, %v799_v57 }
  0x39   :  { %660 = vmatprep.subr.bf16.mxu1 %v640_v20 }
  0x3a   :  { %vm421_vm4 = vcmp.eq.s32.totalorder %v405_v16, %v801_v58 }
  0x3b   :  { %79 = vxpose.xlu0.b32.cont [6/16] %v47_v19, 128  ;;  %643 = vmatpush3.bf16.msra.mxu0 %v640_v20 }
  0x3c   :  { %645 = vmatprep.subr.bf16.mxu0 %v644_v24  ;;  %668 = vmatpush3.bf16.msra.mxu1 %v640_v20 }
  0x3d   :  { %661 = vmatprep.subr.bf16.mxu1 %v644_v24 }
  0x3f   :  { %80 = vxpose.xlu0.b32.cont [7/16] %v48_v23, 128  ;;  %647 = vmatpush3.bf16.msra.mxu0 %v644_v24 }
  0x40   :  { %649 = vmatprep.subr.bf16.mxu0 %v648_v28  ;;  %669 = vmatpush3.bf16.msra.mxu1 %v644_v24 }
  0x41   :  { %662 = vmatprep.subr.bf16.mxu1 %v648_v28 }
  0x43   :  { %81 = vxpose.xlu0.b32.cont [8/16] %v49_v27, 128  ;;  %651 = vmatpush3.bf16.msra.mxu0 %v648_v28 }
  0x44   :  { %653 = vmatprep.subr.bf16.mxu0 %v652_v32  ;;  %670 = vmatpush3.bf16.msra.mxu1 %v648_v28 }
  0x45   :  { %663 = vmatprep.subr.bf16.mxu1 %v652_v32 }
  0x47   :  { %82 = vxpose.xlu0.b32.cont [9/16] %v50_v31, 128  ;;  %655 = vmatpush3.bf16.msra.mxu0 %v652_v32 }
  0x48   :  { %671 = vmatpush3.bf16.msra.mxu1 %v652_v32  ;;  %v407_v32 = vadd.s32 56, %v799_v57 }
  0x4a   :  { %vm423_vm6 = vcmp.eq.s32.totalorder %v407_v32, %v801_v58 }
  0x4b   :  { %83 = vxpose.xlu0.b32.cont [10/16] %v51_v33, 128  ;;  %v406_v33 = vadd.s32 48, %v799_v57 }
  0x4d   :  { %vm422_vm7 = vcmp.eq.s32.totalorder %v406_v33, %v801_v58 }
  0x4f   :  { %84 = vxpose.xlu0.b32.cont [11/16] %v52_v34, 128 }
  0x53   :  { %85 = vxpose.xlu0.b32.cont [12/16] %v53_v35, 128 }
  0x57   :  { %86 = vxpose.xlu0.b32.cont [13/16] %v54_v36, 128 }
  0x5b   :  { %87 = vxpose.xlu0.b32.cont [14/16] %v55_v37, 128 }
  0x5f   :  { %88 = vxpose.xlu0.b32.cont [15/16] %v56_v38, 128 }
  0x63   :  { %89 = vxpose.xlu0.b32.end [16/16] %v57_v39, 128 }
  0xa7   :  { %v90_v40 = vpop.trf.xlu0 }
  0xa8   :  { %600 = vmatprep.mubr.f32.mxu0 %v90_v40 }
  0xab   :  { %v91_v41 = vpop.trf.xlu0 }
  0xac   :  { %601 = vmatmul.mubr.f32.vlgmr.msra.gmra.mrb[0].mxu0 %v91_v41 }
  0xaf   :  { %v92_v42 = vpop.trf.xlu0 }
  0xb0   :  { %603 = vmatprep.mubr.f32.mxu0 %v92_v42 }
  0xb3   :  { %v93_v43 = vpop.trf.xlu0 }
  0xb4   :  { %604 = vmatmul.mubr.f32.gmra.mrb[2].mxu0 %v93_v43 }
  0xb7   :  { %v94_v44 = vpop.trf.xlu0 }
  0xb8   :  { %606 = vmatprep.mubr.f32.mxu0 %v94_v44 }
  0xbb   :  { %v95_v45 = vpop.trf.xlu0 }
  0xbc   :  { %607 = vmatmul.mubr.f32.gmra.mrb[4].mxu0 %v95_v45 }
  0xbf   :  { %v96_v46 = vpop.trf.xlu0 }
  0xc0   :  { %609 = vmatprep.mubr.f32.mxu0 %v96_v46 }
  0xc3   :  { %v97_v47 = vpop.trf.xlu0 }
  0xc4   :  { %610 = vmatmul.mubr.f32.gmra.mrb[6].mxu0 %v97_v47 }
  0xc7   :  { %v98_v48 = vpop.trf.xlu0 }
  0xc8   :  { %612 = vmatprep.mubr.f32.mxu1 %v98_v48  ;;  %v409_v48 = vadd.s32 72, %v799_v57 }
  0xca   :  { %vm425_vm8 = vcmp.eq.s32.totalorder %v409_v48, %v801_v58 }
  0xcb   :  { %v99_v49 = vpop.trf.xlu0 }
  0xcc   :  { %613 = vmatmul.mubr.f32.vlgmr.msra.gmra.mrb[0].mxu1 %v99_v49  ;;  %v408_v49 = vadd.s32 64, %v799_v57 }
  0xce   :  { %vm424_vm9 = vcmp.eq.s32.totalorder %v408_v49, %v801_v58 }
  0xcf   :  { %v100_v50 = vpop.trf.xlu0 }
  0xd0   :  { %615 = vmatprep.mubr.f32.mxu1 %v100_v50 }
  0xd3   :  { %v101_v51 = vpop.trf.xlu0 }
  0xd4   :  { %616 = vmatmul.mubr.f32.gmra.mrb[2].mxu1 %v101_v51 }
  0xd7   :  { %v102_v52 = vpop.trf.xlu0 }
  0xd8   :  { %618 = vmatprep.mubr.f32.mxu1 %v102_v52 }
  0xdb   :  { %v103_v53 = vpop.trf.xlu0 }
  0xdc   :  { %619 = vmatmul.mubr.f32.gmra.mrb[4].mxu1 %v103_v53 }
  0xdf   :  { %v104_v54 = vpop.trf.xlu0 }
  0xe0   :  { %621 = vmatprep.mubr.f32.mxu1 %v104_v54 }
  0xe3   :  { %v105_v55 = vpop.trf.xlu0 }
  0xe4   :  { %622 = vmatmul.mubr.f32.gmra.mrb[6].mxu1 %v105_v55 }
 0x17f   :  { %v602_v60 = vpop.f32.mrb[0].mxu0 }
 0x180   :  { %v343_v61 = vmul.f32 %v602_v60, %v602_v60  ;;  %v433_v62 = vsel %vm417_vm0, %v602_v60, 0.0  ;;  %v172_v63 = vpop.f32.mrb[1].mxu0  ;;  %vm387_vm0 = vcmp.eq.s32.totalorder %v799_v57, 0 }
 0x181   :  { %v449_v0 = vmul.f32 %v433_v62, %v433_v62  ;;  %v342_v1 = vmul.f32 %v172_v63, %v172_v63  ;;  %v432_v2 = vsel %vm416_vm1, %v172_v63, 0.0  ;;  %vm388_vm1 = vcmp.eq.s32.totalorder %v801_v58, 0 }
 0x182   :  { %v448_v3 = vmul.f32 %v432_v2, %v432_v2  ;;  %v489_v4 = vadd.f32 %v433_v62, %v432_v2  ;;  %v411_v2 = vadd.s32 88, %v799_v57 }
 0x183   :  { %v358_v7 = vadd.f32 %v343_v61, %v342_v1 }
 0x184   :  { %v464_v8 = vadd.f32 %v449_v0, %v448_v3  ;;  %v410_v3 = vadd.s32 80, %v799_v57  ;;  %vm427_vm10 = vcmp.eq.s32.totalorder %v411_v2, %v801_v58 }
 0x186   :  { %vm426_vm11 = vcmp.eq.s32.totalorder %v410_v3, %v801_v58 }
 0x187   :  { %v605_v9 = vpop.f32.mrb[2].mxu0 }
 0x188   :  { %v182_v10 = vpop.f32.mrb[3].mxu0  ;;  %v435_v11 = vsel %vm419_vm2, %v605_v9, 0.0  ;;  %v345_v18 = vmul.f32 %v605_v9, %v605_v9  ;;  %vm389_vm2 = vmand %vm387_vm0, %vm388_vm1 }
 0x189   :  { %v344_v12 = vmul.f32 %v182_v10, %v182_v10  ;;  %v434_v13 = vsel %vm418_vm3, %v182_v10, 0.0  ;;  %v451_v20 = vmul.f32 %v435_v11, %v435_v11 }
 0x18a   :  { %v450_v14 = vmul.f32 %v434_v13, %v434_v13  ;;  %v490_v15 = vadd.f32 %v489_v4, %v434_v13 }
 0x18b   :  { %v359_v19 = vadd.f32 %v358_v7, %v344_v12 }
 0x18c   :  { %v465_v21 = vadd.f32 %v464_v8, %v450_v14  ;;  %v491_v22 = vadd.f32 %v490_v15, %v435_v11 }
 0x18d   :  { %v360_v23 = vadd.f32 %v359_v19, %v345_v18  ;;  %v413_v18 = vadd.s32 104, %v799_v57  ;;  %v412_v19 = vadd.s32 96, %v799_v57 }
 0x18e   :  { %v466_v24 = vadd.f32 %v465_v21, %v451_v20 }
 0x18f   :  { %v608_v25 = vpop.f32.mrb[4].mxu0  ;;  %vm429_vm12 = vcmp.eq.s32.totalorder %v413_v18, %v801_v58  ;;  %vm428_vm13 = vcmp.eq.s32.totalorder %v412_v19, %v801_v58 }
 0x190   :  { %v192_v26 = vpop.f32.mrb[5].mxu0  ;;  %v437_v27 = vsel %vm421_vm4, %v608_v25, 0.0  ;;  %v347_v34 = vmul.f32 %v608_v25, %v608_v25 }
 0x191   :  { %v346_v28 = vmul.f32 %v192_v26, %v192_v26  ;;  %v436_v29 = vsel %vm420_vm5, %v192_v26, 0.0  ;;  %v453_v36 = vmul.f32 %v437_v27, %v437_v27 }
 0x192   :  { %v452_v30 = vmul.f32 %v436_v29, %v436_v29  ;;  %v492_v31 = vadd.f32 %v491_v22, %v436_v29 }
 0x193   :  { %v361_v35 = vadd.f32 %v360_v23, %v346_v28 }
 0x194   :  { %v467_v37 = vadd.f32 %v466_v24, %v452_v30  ;;  %v493_v38 = vadd.f32 %v492_v31, %v437_v27 }
 0x195   :  { %v362_v39 = vadd.f32 %v361_v35, %v347_v34  ;;  %v415_v34 = vadd.s32 120, %v799_v57  ;;  %v414_v35 = vadd.s32 112, %v799_v57 }
 0x196   :  { %v468_v40 = vadd.f32 %v467_v37, %v453_v36 }
 0x197   :  { %v611_v41 = vpop.f32.mrb[6].mxu0  ;;  %vm431_vm14 = vcmp.eq.s32.totalorder %v415_v34, %v801_v58  ;;  %vm430_vm15 = vcmp.eq.s32.totalorder %v414_v35, %v801_v58 }
 0x198   :  { %v202_v42 = vpop.f32.mrb[7].mxu0  ;;  %v439_v43 = vsel %vm423_vm6, %v611_v41, 0.0  ;;  %v349_v50 = vmul.f32 %v611_v41, %v611_v41 }
 0x199   :  { %v348_v44 = vmul.f32 %v202_v42, %v202_v42  ;;  %v438_v45 = vsel %vm422_vm7, %v202_v42, 0.0  ;;  %v455_v52 = vmul.f32 %v439_v43, %v439_v43 }
 0x19a   :  { %v454_v46 = vmul.f32 %v438_v45, %v438_v45  ;;  %v494_v47 = vadd.f32 %v493_v38, %v438_v45 }
 0x19b   :  { %v363_v51 = vadd.f32 %v362_v39, %v348_v44 }
 0x19c   :  { %v469_v53 = vadd.f32 %v468_v40, %v454_v46  ;;  %v495_v54 = vadd.f32 %v494_v47, %v439_v43 }
 0x19d   :  { %v364_v55 = vadd.f32 %v363_v51, %v349_v50 }
 0x19e   :  { %v470_v56 = vadd.f32 %v469_v53, %v455_v52 }
 0x19f   :  { %v614_v59 = vpop.f32.mrb[0].mxu1 }
 0x1a0   :  { %v212_v60 = vpop.f32.mrb[1].mxu1  ;;  %v441_v61 = vsel %vm425_vm8, %v614_v59, 0.0  ;;  %v351_v4 = vmul.f32 %v614_v59, %v614_v59 }
 0x1a1   :  { %v350_v62 = vmul.f32 %v212_v60, %v212_v60  ;;  %v440_v63 = vsel %vm424_vm9, %v212_v60, 0.0  ;;  %v457_v6 = vmul.f32 %v441_v61, %v441_v61 }
 0x1a2   :  { %v456_v0 = vmul.f32 %v440_v63, %v440_v63  ;;  %v496_v1 = vadd.f32 %v495_v54, %v440_v63 }
 0x1a3   :  { %v365_v5 = vadd.f32 %v364_v55, %v350_v62 }
 0x1a4   :  { %v471_v7 = vadd.f32 %v470_v56, %v456_v0  ;;  %v497_v8 = vadd.f32 %v496_v1, %v441_v61 }
 0x1a5   :  { %v366_v9 = vadd.f32 %v365_v5, %v351_v4 }
 0x1a6   :  { %v472_v10 = vadd.f32 %v471_v7, %v457_v6 }
 0x1a7   :  { %v617_v11 = vpop.f32.mrb[2].mxu1 }
 0x1a8   :  { %v222_v12 = vpop.f32.mrb[3].mxu1  ;;  %v443_v13 = vsel %vm427_vm10, %v617_v11, 0.0  ;;  %v353_v20 = vmul.f32 %v617_v11, %v617_v11 }
 0x1a9   :  { %v352_v14 = vmul.f32 %v222_v12, %v222_v12  ;;  %v442_v15 = vsel %vm426_vm11, %v222_v12, 0.0  ;;  %v459_v22 = vmul.f32 %v443_v13, %v443_v13 }
 0x1aa   :  { %v458_v16 = vmul.f32 %v442_v15, %v442_v15  ;;  %v498_v17 = vadd.f32 %v497_v8, %v442_v15 }
 0x1ab   :  { %v367_v21 = vadd.f32 %v366_v9, %v352_v14 }
 0x1ac   :  { %v473_v23 = vadd.f32 %v472_v10, %v458_v16  ;;  %v499_v24 = vadd.f32 %v498_v17, %v443_v13 }
 0x1ad   :  { %v368_v25 = vadd.f32 %v367_v21, %v353_v20 }
 0x1ae   :  { %v474_v26 = vadd.f32 %v473_v23, %v459_v22 }
 0x1af   :  { %v620_v27 = vpop.f32.mrb[4].mxu1 }
 0x1b0   :  { %v232_v28 = vpop.f32.mrb[5].mxu1  ;;  %v445_v29 = vsel %vm429_vm12, %v620_v27, 0.0  ;;  %v355_v36 = vmul.f32 %v620_v27, %v620_v27 }
 0x1b1   :  { %v354_v30 = vmul.f32 %v232_v28, %v232_v28  ;;  %v444_v31 = vsel %vm428_vm13, %v232_v28, 0.0  ;;  %v461_v38 = vmul.f32 %v445_v29, %v445_v29 }
 0x1b2   :  { %v460_v32 = vmul.f32 %v444_v31, %v444_v31  ;;  %v500_v33 = vadd.f32 %v499_v24, %v444_v31 }
 0x1b3   :  { %v369_v37 = vadd.f32 %v368_v25, %v354_v30 }
 0x1b4   :  { %v475_v39 = vadd.f32 %v474_v26, %v460_v32  ;;  %v501_v40 = vadd.f32 %v500_v33, %v445_v29 }
 0x1b5   :  { %v370_v41 = vadd.f32 %v369_v37, %v355_v36 }
 0x1b6   :  { %v476_v42 = vadd.f32 %v475_v39, %v461_v38 }
 0x1b7   :  { %v623_v43 = vpop.f32.mrb[6].mxu1 }
 0x1b8   :  { %v242_v44 = vpop.f32.mrb[7].mxu1  ;;  %v447_v45 = vsel %vm431_vm14, %v623_v43, 0.0  ;;  %v357_v50 = vmul.f32 %v623_v43, %v623_v43 }
 0x1b9   :  { %v356_v46 = vmul.f32 %v242_v44, %v242_v44  ;;  %v446_v47 = vsel %vm430_vm15, %v242_v44, 0.0  ;;  %v463_v52 = vmul.f32 %v447_v45, %v447_v45 }
 0x1ba   :  { %v462_v48 = vmul.f32 %v446_v47, %v446_v47  ;;  %v502_v49 = vadd.f32 %v501_v40, %v446_v47 }
 0x1bb   :  { %v371_v51 = vadd.f32 %v370_v41, %v356_v46 }
 0x1bc   :  { %v477_v53 = vadd.f32 %v476_v42, %v462_v48  ;;  %v503_v54 = vadd.f32 %v502_v49, %v447_v45 }
 0x1bd   :  { %v372_v55 = vadd.f32 %v371_v51, %v357_v50 }
 0x1be   :  { %v478_v56 = vadd.f32 %v477_v53, %v463_v52 }
 0x1bf   :  { %373 = vadd.xlane.f32.xlu1 %v372_v55 }
 0x1c3   :  { %479 = vadd.xlane.f32.xlu1 %v478_v56 }
 0x1c7   :  { %504 = vadd.xlane.f32.xlu1 %v503_v54 }
 0x24c   :  { %v374_v59 = vpop.xlane.xlu1 %373 }
 0x24d   :  { %v375_v60 = vrot.slane %v374_v59, 4 }
 0x24f   :  { %v376_v61 = vadd.f32 %v375_v60, %v374_v59 }
 0x250   :  { %v480_v62 = vpop.xlane.xlu1 %479 }
 0x251   :  { %v377_v63 = vrot.slane %v376_v61, 2  ;;  %v481_v0 = vrot.slane %v480_v62, 4 }
 0x253   :  { %v482_v1 = vadd.f32 %v481_v0, %v480_v62  ;;  %v378_v2 = vadd.f32 %v377_v63, %v376_v61 }
 0x254   :  { %v505_v3 = vpop.xlane.xlu1 %504 }
 0x255   :  { %v483_v4 = vrot.slane %v482_v1, 2  ;;  %v506_v5 = vrot.slane %v505_v3, 4  ;;  %v379_v6 = vrot.slane %v378_v2, 1 }
 0x257   :  { %v507_v7 = vadd.f32 %v506_v5, %v505_v3  ;;  %v380_v8 = vadd.f32 %v379_v6, %v378_v2  ;;  %v484_v9 = vadd.f32 %v483_v4, %v482_v1 }
 0x259   :  { %v508_v10 = vrot.slane %v507_v7, 2  ;;  %672 = vpush %v380_v8  ;;  %v485_v11 = vrot.slane %v484_v9, 1 }
 0x25b   :  { %v509_v12 = vadd.f32 %v508_v10, %v507_v7  ;;  %v486_v13 = vadd.f32 %v485_v11, %v484_v9 }
 0x25d   :  { %674 = vpush %v486_v13  ;;  %v510_v14 = vrot.slane %v509_v12, 1 }
 0x25f   :  { %v511_v15 = vadd.f32 %v510_v14, %v509_v12 }
 0x261   :  { %676 = vpush %v511_v15 }
 0x28a   :  { %s673_s1 = spop %672 }
 0x28b   :  { %s382_s11 = smul.f32 7.96875e-05, %s673_s1 }
 0x28e   :  { %s675_s6 = spop %674 }
 0x28f   :  { %s488_s7 = smul.f32 0.015545312, %s675_s6 }
 0x292   :  { %s677_s8 = spop %676 }
 0x293   :  { %s513_s9 = smul.f32 0.25, %s677_s8 }
 0x295   :  { %s514_s10 = ssub.f32 %s488_s7, %s513_s9 }
 0x297   :  { %s515_s12 = sadd.f32 128.0, %s514_s10 }
 0x299   :  { %s516_s15 = sadd.f32 %s515_s12, %s382_s11 }
 0x29b   :  { %v517_v16 = vstv %s516_s15 }
 0x29c   :  { %v518_v17 = vsel %vm389_vm2, %v517_v16, 0.0 }
 0x29d   :  { %519 = vst [vmem:[#allocation8] sm:$0xff] %v518_v17 }
 0x29e   :  { %738 = shalt.err (!%p735_p6)
}
 0x29f   :  { %s739_s19 = scalar_lea.hbm %s851_s2, 128 }
 0x2a0   :  { %p740_p7 = scmp.ne.s32.totalorder %s851_s2, %s739_s19  ;;  %p743_p8 = scmp.lt.u32.totalorder %s739_s19, %s851_s2 }
 0x2a2   :  { %p745_p9 = pnand %p743_p8, %p740_p7 }
 0x2a4   :  { %748 = shalt.err (!%p745_p9)
}
 0x2a5   :  { %529 = dma.vmem_to_hbm [thread:$0]  %s527_s14, 128, %s851_s2, [#allocation5]  }
 0x2a6   :  { %753 = dma.done.wait [#allocation5], 128  }
 0x2a7   :  { %754 = vsyncadd [#allocation5], 4294967168 }
 0x2a8   :  { %533 = vsyncpa [#allocation4], 1 }
 0x2a9   :  { %534 = vsyncpa [#allocation7], 1 }
 0x2aa   :  { %535 = vsyncpa [#allocation5], 1 }

</bundles_post_ra>
